<compile_context>
chip_gen: v5e
topology: v5e:2x2
jax: 0.10.0
libtpu: 0.0.40
codegen_flags: <defaults>
</compile_context>

<pallas_src>
import functools
import math

import jax
import jax.numpy as jnp
from jax.experimental import pallas as pl
from jax.experimental.pallas import tpu as pltpu

_LANES = 128
_SUBLANES = 8


def _nmse_partials_kernel(xhat_ref, x_ref, mse_ref, pow_ref, *,
                          n_total, tn, needs_mask):
    ni = pl.program_id(1)

    @pl.when(ni == 0)
    def _init():
        mse_ref[...] = jnp.zeros_like(mse_ref)
        pow_ref[...] = jnp.zeros_like(pow_ref)

    x = x_ref[...].astype(jnp.float32)       # (tb, tn)
    xh = xhat_ref[...].astype(jnp.float32)   # (tb, tn)

    xc = x - 0.5                             # centering cancels in (x - x_hat)
    d = x - xh
    p_sq = xc * xc
    m_sq = d * d

    if needs_mask:
        # Last N block is ragged: zero the unspecified lane tail before reducing.
        col = jax.lax.broadcasted_iota(jnp.int32, x.shape, 1)
        valid = (ni * tn + col) < n_total
        p_sq = jnp.where(valid, p_sq, 0.0)
        m_sq = jnp.where(valid, m_sq, 0.0)

    tb = x.shape[0]
    mse_ref[...] += jnp.sum(m_sq, axis=-1).reshape(1, 1, tb)
    pow_ref[...] += jnp.sum(p_sq, axis=-1).reshape(1, 1, tb)


def nmse_loss(x_hat, x, reduction="sum", *, target_block_bytes=2 * 1024 * 1024):
    """Pallas equivalent of NMSELoss(reduction)(x_hat, x).

    x_hat, x: (B, 2, H, W) arrays (channel 0 = real, channel 1 = imag).
    Returns a float32 scalar.
    """
    assert x.shape == x_hat.shape and x.ndim == 4 and x.shape[1] == 2
    B = x.shape[0]
    N = math.prod(x.shape[1:])               # 2 * H * W
    itemsize = jnp.dtype(x.dtype).itemsize

    # Batch tile: sublane-aligned, and (for moderate B) at least two batch
    # blocks so the "parallel" axis shards across both v7x TensorCores.
    if B <= _SUBLANES:
        tb = B                               # block dim == full array dim
    else:
        tb = min(128, max(_SUBLANES, (pl.cdiv(B, 2) // _SUBLANES) * _SUBLANES))
    num_b_blocks = pl.cdiv(B, tb)

    # N tile: ~target_block_bytes per input block, lane-aligned.  If the whole
    # row fits, use the exact row length (Mosaic masks the lane tail itself).
    n_ceil = pl.cdiv(N, _LANES) * _LANES
    tn_budget = max(
        _LANES, (target_block_bytes // max(1, tb * itemsize)) // _LANES * _LANES)
    if tn_budget >= n_ceil:
        tn = N
        needs_mask = False
    else:
        tn = tn_budget
        needs_mask = (N % tn) != 0
    num_n_blocks = pl.cdiv(N, tn)

    # Metadata-only reshapes of contiguous NCHW tensors — no HBM copies.
    xf = x.reshape(B, N)
    xhf = x_hat.reshape(B, N)

    in_spec = pl.BlockSpec((tb, tn), lambda b, n: (b, n))
    out_spec = pl.BlockSpec((1, 1, tb), lambda b, n: (b, 0, 0))
    out_shape = jax.ShapeDtypeStruct((num_b_blocks, 1, tb), jnp.float32)

    kernel = functools.partial(
        _nmse_partials_kernel, n_total=N, tn=tn, needs_mask=needs_mask)

    cost = pl.CostEstimate(
        flops=7 * B * N,
        transcendentals=0,
        bytes_accessed=2 * B * N * itemsize + 2 * num_b_blocks * tb * 4,
    )

    mse, power = pl.pallas_call(
        kernel,
        out_shape=(out_shape, out_shape),
        grid_spec=pltpu.PrefetchScalarGridSpec(
            num_scalar_prefetch=0,
            grid=(num_b_blocks, num_n_blocks),
            in_specs=[in_spec, in_spec],
            out_specs=[out_spec, out_spec],
        ),
        compiler_params=pltpu.CompilerParams(
            dimension_semantics=("parallel", "arbitrary"),
        ),
        cost_estimate=cost,
    )(xhf, xf)

    mse = mse.reshape(-1)[:B]                # drop ragged-batch garbage rows
    power = power.reshape(-1)[:B]
    nmse = mse / power                       # matches torch ref (no 0-power guard)
    if reduction == "mean":
        return jnp.mean(nmse)
    return jnp.sum(nmse)


def _nmse_ref(x_hat, x, reduction="sum"):
    x = x.astype(jnp.float32)
    x_hat = x_hat.astype(jnp.float32)
    B = x.shape[0]
    xr = x[:, 0].reshape(B, -1) - 0.5
    xi = x[:, 1].reshape(B, -1) - 0.5
    hr = x_hat[:, 0].reshape(B, -1) - 0.5
    hi = x_hat[:, 1].reshape(B, -1) - 0.5
    power = jnp.sum(xr**2 + xi**2, axis=1)
    mse = jnp.sum((xr - hr) ** 2 + (xi - hi) ** 2, axis=1)
    nmse = mse / power
    return jnp.mean(nmse) if reduction == "mean" else jnp.sum(nmse)


if __name__ == "__main__":
    key = jax.random.PRNGKey(0)
    k1, k2, k3, k4, k5, k6 = jax.random.split(key, 6)

    # Primary shape: (B, 2, H, W), inputs in [0, 1] to match the 0.5 centering.
    x = jax.random.uniform(k1, (2, 2, 16, 16), dtype=jnp.float32)
    x_hat = jax.random.uniform(k2, (2, 2, 16, 16), dtype=jnp.float32)

    out = jax.block_until_ready(nmse_loss(x_hat, x, reduction="sum"))
    ref = _nmse_ref(x_hat, x, reduction="sum")
    assert jnp.allclose(out, ref, rtol=1e-5, atol=1e-5), (out, ref)

    out_m = jax.block_until_ready(nmse_loss(x_hat, x, reduction="mean"))
    ref_m = _nmse_ref(x_hat, x, reduction="mean")
    assert jnp.allclose(out_m, ref_m, rtol=1e-5, atol=1e-5), (out_m, ref_m)

    # Odd spatial size: single block whose dims equal the full (ragged) array.
    x2 = jax.random.uniform(k3, (3, 2, 5, 7), dtype=jnp.float32)
    x2_hat = jax.random.uniform(k4, (3, 2, 5, 7), dtype=jnp.float32)
    out2 = jax.block_until_ready(nmse_loss(x2_hat, x2, reduction="sum"))
    ref2 = _nmse_ref(x2_hat, x2, reduction="sum")
    assert jnp.allclose(out2, ref2, rtol=1e-5, atol=1e-5), (out2, ref2)

    # Multi-block batch (ragged tail rows dropped) + tiled, ragged N axis:
    # exercises the resident-accumulator path and the iota column mask.
    x3 = jax.random.uniform(k5, (10, 2, 24, 24), dtype=jnp.float32)
    x3_hat = jax.random.uniform(k6, (10, 2, 24, 24), dtype=jnp.float32)
    out3 = jax.block_until_ready(
        nmse_loss(x3_hat, x3, reduction="sum", target_block_bytes=8192))
    ref3 = _nmse_ref(x3_hat, x3, reduction="sum")
    assert jnp.allclose(out3, ref3, rtol=1e-5, atol=1e-5), (out3, ref3)

    print("KERNEL_OK")
</pallas_src>

<mosaic_0001>
module attributes {stable_mosaic.version = 11 : i64} {
  func.func @_nmse_partials_kernel(%arg0: i32, %arg1: i32, %arg2: memref<2x512xf32, #tpu.memory_space<vmem>>, %arg3: memref<2x512xf32, #tpu.memory_space<vmem>>, %arg4: memref<1x1x2xf32, #tpu.memory_space<vmem>>, %arg5: memref<1x1x2xf32, #tpu.memory_space<vmem>>) attributes {dimension_semantics = [#tpu.dimension_semantics<parallel>, #tpu.dimension_semantics<arbitrary>], iteration_bounds = array<i64: 1, 1>, scalar_prefetch = 0 : i64, scratch_operands = 0 : i64, tpu.core_type = #tpu.core_type<tc>, window_params = [{transform_indices = @transform_0, window_bounds = array<i64: 2, 512>}, {transform_indices = @transform_1, window_bounds = array<i64: 2, 512>}, {transform_indices = @transform_2, window_bounds = array<i64: 1, 1, 2>}, {transform_indices = @transform_3, window_bounds = array<i64: 1, 1, 2>}]} {
    %c0_i32 = arith.constant 0 : i32
    %0 = arith.cmpi eq, %arg1, %c0_i32 : i32
    %1 = arith.extui %0 : i1 to i32
    %c0_i32_0 = arith.constant 0 : i32
    %2 = arith.cmpi ne, %1, %c0_i32_0 : i32
    scf.if %2 {
      %cst_18 = arith.constant 0.000000e+00 : f32
      %20 = vector.broadcast %cst_18 : f32 to vector<1x1x2xf32>
      %c0_19 = arith.constant 0 : index
      %c0_20 = arith.constant 0 : index
      %c0_21 = arith.constant 0 : index
      %21 = vector.load %arg4[%c0_19, %c0_20, %c0_21] : memref<1x1x2xf32, #tpu.memory_space<vmem>>, vector<1x1x2xf32>
      tpu.vector_store %arg4[%c0_19, %c0_20, %c0_21], %20 {strides = array<i32>} : memref<1x1x2xf32, #tpu.memory_space<vmem>>, vector<1x1x2xf32>,
      %cst_22 = arith.constant 0.000000e+00 : f32
      %22 = vector.broadcast %cst_22 : f32 to vector<1x1x2xf32>
      %c0_23 = arith.constant 0 : index
      %c0_24 = arith.constant 0 : index
      %c0_25 = arith.constant 0 : index
      %23 = vector.load %arg5[%c0_23, %c0_24, %c0_25] : memref<1x1x2xf32, #tpu.memory_space<vmem>>, vector<1x1x2xf32>
      tpu.vector_store %arg5[%c0_23, %c0_24, %c0_25], %22 {strides = array<i32>} : memref<1x1x2xf32, #tpu.memory_space<vmem>>, vector<1x1x2xf32>,
    } else {
    }
    %c0 = arith.constant 0 : index
    %c0_1 = arith.constant 0 : index
    %3 = vector.load %arg3[%c0, %c0_1] : memref<2x512xf32, #tpu.memory_space<vmem>>, vector<2x512xf32>
    %c0_2 = arith.constant 0 : index
    %c0_3 = arith.constant 0 : index
    %4 = vector.load %arg2[%c0_2, %c0_3] : memref<2x512xf32, #tpu.memory_space<vmem>>, vector<2x512xf32>
    %cst = arith.constant 5.000000e-01 : f32
    %5 = vector.broadcast %cst : f32 to vector<2x512xf32>
    %6 = arith.subf %3, %5 : vector<2x512xf32>
    %7 = arith.subf %3, %4 : vector<2x512xf32>
    %8 = arith.mulf %6, %6 : vector<2x512xf32>
    %9 = arith.mulf %7, %7 : vector<2x512xf32>
    %c0_4 = arith.constant 0 : index
    %c0_5 = arith.constant 0 : index
    %c0_6 = arith.constant 0 : index
    %10 = vector.load %arg4[%c0_4, %c0_5, %c0_6] : memref<1x1x2xf32, #tpu.memory_space<vmem>>, vector<1x1x2xf32>
    %cst_7 = arith.constant dense<0.000000e+00> : vector<2xf32>
    %11 = vector.multi_reduction <add>, %9, %cst_7 [1] : vector<2x512xf32> to vector<2xf32>
    %12 = vector.shape_cast %11 : vector<2xf32> to vector<1x1x2xf32>
    %13 = arith.addf %10, %12 : vector<1x1x2xf32>
    %c0_8 = arith.constant 0 : index
    %c0_9 = arith.constant 0 : index
    %c0_10 = arith.constant 0 : index
    %14 = vector.load %arg4[%c0_8, %c0_9, %c0_10] : memref<1x1x2xf32, #tpu.memory_space<vmem>>, vector<1x1x2xf32>
    tpu.vector_store %arg4[%c0_8, %c0_9, %c0_10], %13 {strides = array<i32>} : memref<1x1x2xf32, #tpu.memory_space<vmem>>, vector<1x1x2xf32>,
    %c0_11 = arith.constant 0 : index
    %c0_12 = arith.constant 0 : index
    %c0_13 = arith.constant 0 : index
    %15 = vector.load %arg5[%c0_11, %c0_12, %c0_13] : memref<1x1x2xf32, #tpu.memory_space<vmem>>, vector<1x1x2xf32>
    %cst_14 = arith.constant dense<0.000000e+00> : vector<2xf32>
    %16 = vector.multi_reduction <add>, %8, %cst_14 [1] : vector<2x512xf32> to vector<2xf32>
    %17 = vector.shape_cast %16 : vector<2xf32> to vector<1x1x2xf32>
    %18 = arith.addf %15, %17 : vector<1x1x2xf32>
    %c0_15 = arith.constant 0 : index
    %c0_16 = arith.constant 0 : index
    %c0_17 = arith.constant 0 : index
    %19 = vector.load %arg5[%c0_15, %c0_16, %c0_17] : memref<1x1x2xf32, #tpu.memory_space<vmem>>, vector<1x1x2xf32>
    tpu.vector_store %arg5[%c0_15, %c0_16, %c0_17], %18 {strides = array<i32>} : memref<1x1x2xf32, #tpu.memory_space<vmem>>, vector<1x1x2xf32>,
    return
  }
  func.func @transform_0(%arg0: i32, %arg1: i32) -> (i32, i32) {
    %c0_i32 = arith.constant 0 : i32
    return %arg0, %arg1 : i32, i32
  }
  func.func @transform_1(%arg0: i32, %arg1: i32) -> (i32, i32) {
    %c0_i32 = arith.constant 0 : i32
    return %arg0, %arg1 : i32, i32
  }
  func.func @transform_2(%arg0: i32, %arg1: i32) -> (i32, i32, i32) {
    %c0_i32 = arith.constant 0 : i32
    %c0_i32_0 = arith.constant 0 : i32
    %c0_i32_1 = arith.constant 0 : i32
    return %arg0, %c0_i32, %c0_i32_0 : i32, i32, i32
  }
  func.func @transform_3(%arg0: i32, %arg1: i32) -> (i32, i32, i32) {
    %c0_i32 = arith.constant 0 : i32
    %c0_i32_0 = arith.constant 0 : i32
    %c0_i32_1 = arith.constant 0 : i32
    return %arg0, %c0_i32, %c0_i32_0 : i32, i32, i32
  }
}

</mosaic_0001>

<bundles_post_ra>
// kernel: tpu_custom_call.1
= control target key start
LH: loop header
LB: loop body
LE: loop exit
PB: predicated region body
PF: predicated region fallthrough
CT: control target
= control target key end

     0   :  { %9 = vsyncpa [#allocation3], 0  ;;  %s325_s0 = inlined_call_operand.hbm [shape: f32[2,512], index: 0, kind: input, shape index: {}]   ;;  %s326_s1 = inlined_call_operand.hbm [shape: f32[2,512], index: 1, kind: input, shape index: {}]   ;;  %s327_s2 = inlined_call_operand.hbm [shape: f32[1,1,2], index: 2, kind: output, shape index: {0}]   ;;  %s328_s3 = inlined_call_operand.hbm [shape: f32[1,1,2], index: 3, kind: output, shape index: {1}]  }
   0x1   :  { %10 = vsyncpa [#allocation6], 0 }
   0x2   :  { %11 = vsyncpa [#allocation4], 0 }
   0x3   :  { %12 = vsyncpa [#allocation9], 0  ;;  %s18_s14 = sshll.u32 %s325_s0, 4  ;;  %s275_s15 = smov [#allocation2]   ;;  %s19_s14 = int_to_ptr.hbm [resolvable:$true] %s18_s14 }
   0x4   :  { %s20_s16 = sshll.u32 %s275_s15, 4  ;;  %s29_s19 = sshll.u32 %s326_s1, 4  ;;  %s21_s16 = int_to_ptr.vmem [resolvable:$true] %s20_s16  ;;  %s30_s19 = int_to_ptr.hbm [resolvable:$true] %s29_s19 }
   0x5   :  { %23 = dma.hbm_to_vmem [thread:$0]  %s19_s14, 128, %s21_s16, [#allocation3]  }
   0x6   :  { %s276_s20 = smov [#allocation5]  }
   0x7   :  { %s31_s21 = sshll.u32 %s276_s20, 4  ;;  %s32_s21 = int_to_ptr.vmem [resolvable:$true] %s31_s21 }
   0x8   :  { %34 = dma.hbm_to_vmem [thread:$0]  %s30_s19, 128, %s32_s21, [#allocation6]  }
   0x9   :  { %267 = dma.done.wait [#allocation3], 128  }
   0xa   :  { %268 = vsyncadd [#allocation3], 4294967168 }
   0xb   :  { %269 = dma.done.wait [#allocation6], 128  }
   0xc   :  { %270 = vsyncadd [#allocation6], 4294967168  ;;  %v50_v0 = vld [vmem:[#allocation5] sm:$0xff]  ;;  %v51_v1 = vld [vmem:[#allocation2] sm:$0xff]  ;;  %vm67_vm0 = vcmask 1041408   ;;  %v277_v15 = vmov 0   ;;  %v87_v34 = vlaneseq }
   0xd   :  { %v53_v2 = vsub.f32 %v50_v0, %v51_v1  ;;  %169 = vset.pattern.permute.xlu1 %v277_v15  ;;  %170 = vset.pattern.permute.xlu0 %v277_v15  ;;  %vm47_vm1 = vcmask 8192   ;;  %v278_v16 = vmov 0.0   ;;  %v162_v20 = vadd.f32 -0.5, %v50_v0  ;;  %s279_s0 = smov [#allocation7]   ;;  %s135_s24 = sshll.u32 %s327_s2, 4  ;;  %s136_s24 = int_to_ptr.hbm [resolvable:$true] %s135_s24 }
   0xe   :  { %48 = vst.msk [vmem:[#allocation7] sm:$0x1] %vm47_vm1, %v278_v16  ;;  %v88_v35 = vand.u32 127, %v87_v34  ;;  %s133_s1 = sshll.u32 %s279_s0, 4  ;;  %s280_s25 = smov [#allocation8]   ;;  %s134_s1 = int_to_ptr.vmem [resolvable:$true] %s133_s1 }
   0xf   :  { %v55_v3 = vmul.f32 %v53_v2, %v53_v2  ;;  %49 = vst.msk [vmem:[#allocation8] sm:$0x1] %vm47_vm1, %v278_v16  ;;  %v54_v21 = vmul.f32 %v162_v20, %v162_v20  ;;  %s144_s26 = sshll.u32 %s280_s25, 4  ;;  %s146_s29 = sshll.u32 %s328_s3, 4  ;;  %s145_s26 = int_to_ptr.vmem [resolvable:$true] %s144_s26  ;;  %s147_s29 = int_to_ptr.hbm [resolvable:$true] %s146_s29 }
  0x11   :  { %58 = vst [vmem:[#allocation1] ss:$4 sm:$0xff] %v55_v3 }
  0x15   :  { %v56_v37 = vld [vmem:[#allocation7] sm:$0x1] }
  0x16   :  { %v94_v45 = vld [vmem:[#allocation8] sm:$0x1] }
  0x18   :  { %v59_v4 = vld.sshfl [vmem:[#allocation1] sm:$0xff pattern:$0x73625140]  ;;  %v60_v5 = vld.sshfl [vmem:[#allocation1 + $0x8] sm:$0xff pattern:$0x73625140] }
  0x19   :  { %v61_v6 = vld.sshfl [vmem:[#allocation1 + $0x10] sm:$0xff pattern:$0x73625140]  ;;  %v62_v7 = vld.sshfl [vmem:[#allocation1 + $0x18] sm:$0xff pattern:$0x73625140] }
  0x1a   :  { %v68_v8 = vsel %vm67_vm0, %v59_v4, 0.0  ;;  %v69_v9 = vsel %vm67_vm0, %v60_v5, 0.0  ;;  %v71_v10 = vsel %vm67_vm0, %v61_v6, 0.0  ;;  %v73_v12 = vsel %vm67_vm0, %v62_v7, 0.0 }
  0x1b   :  { %v70_v11 = vadd.f32 %v69_v9, %v68_v8 }
  0x1d   :  { %v72_v13 = vadd.f32 %v71_v10, %v70_v11 }
  0x1f   :  { %v74_v14 = vadd.f32 %v73_v12, %v72_v13 }
  0x21   :  { %75 = vadd.xlane.f32.xlu0 %v74_v14 }
  0x94   :  { %v76_v17 = vpop.xlane.xlu0 %75 }
  0x95   :  { %v78_v18 = vperm.slane %v76_v17, 0  ;;  %v79_v19 = vperm.slane %v76_v17, 1 }
  0x97   :  { %80 = vst [vmem:[#allocation1] ss:$9 sm:$0xff] %v78_v18 }
  0x98   :  { %82 = vst [vmem:[#allocation1 + $0x1] ss:$9 sm:$0xff] %v79_v19 }
  0x9f   :  { %v83_v22 = vld [vmem:[#allocation1] sm:$0xff] }
  0xa0   :  { %85 = vperm.xlu1 %169, %v83_v22   ;;  %96 = vst [vmem:[#allocation1] ss:$4 sm:$0xff] %v54_v21 }
  0xa7   :  { %v97_v23 = vld.sshfl [vmem:[#allocation1] sm:$0xff pattern:$0x73625140]  ;;  %v98_v24 = vld.sshfl [vmem:[#allocation1 + $0x8] sm:$0xff pattern:$0x73625140] }
  0xa8   :  { %v99_v25 = vld.sshfl [vmem:[#allocation1 + $0x10] sm:$0xff pattern:$0x73625140]  ;;  %v105_v26 = vsel %vm67_vm0, %v97_v23, 0.0  ;;  %v106_v27 = vsel %vm67_vm0, %v98_v24, 0.0 }
  0xa9   :  { %v100_v28 = vld.sshfl [vmem:[#allocation1 + $0x18] sm:$0xff pattern:$0x73625140]  ;;  %v107_v29 = vadd.f32 %v106_v27, %v105_v26  ;;  %v108_v30 = vsel %vm67_vm0, %v99_v25, 0.0 }
  0xaa   :  { %v110_v32 = vsel %vm67_vm0, %v100_v28, 0.0 }
  0xab   :  { %v109_v31 = vadd.f32 %v108_v30, %v107_v29 }
  0xad   :  { %v111_v33 = vadd.f32 %v110_v32, %v109_v31 }
  0xaf   :  { %112 = vadd.xlane.f32.xlu0 %v111_v33 }
 0x112   :  { %v86_v36 = vpop.permute.xlu1 %85 }
 0x113   :  { %v89_v38 = vperm.slane %v86_v36, %v88_v35 }
 0x115   :  { %v91_v39 = vadd.f32 %v89_v38, %v56_v37 }
 0x117   :  { %93 = vst.msk [vmem:[#allocation7] sm:$0x1] %vm47_vm1, %v91_v39 }
 0x118   :  { %138 = dma.vmem_to_hbm [thread:$0]  %s134_s1, 16, %s136_s24, [#allocation4]  }
 0x122   :  { %v113_v40 = vpop.xlane.xlu0 %112 }
 0x123   :  { %v115_v41 = vperm.slane %v113_v40, 0  ;;  %v116_v42 = vperm.slane %v113_v40, 1 }
 0x125   :  { %117 = vst [vmem:[#allocation1] ss:$9 sm:$0xff] %v115_v41 }
 0x126   :  { %119 = vst [vmem:[#allocation1 + $0x1] ss:$9 sm:$0xff] %v116_v42 }
 0x12d   :  { %v120_v43 = vld [vmem:[#allocation1] sm:$0xff] }
 0x12e   :  { %122 = vperm.xlu1 %169, %v120_v43  }
 0x1a0   :  { %v123_v44 = vpop.permute.xlu1 %122 }
 0x1a1   :  { %v124_v46 = vperm.slane %v123_v44, %v88_v35 }
 0x1a3   :  { %v126_v47 = vadd.f32 %v124_v46, %v94_v45 }
 0x1a5   :  { %127 = vst.msk [vmem:[#allocation8] sm:$0x1] %vm47_vm1, %v126_v47 }
 0x1a6   :  { %149 = dma.vmem_to_hbm [thread:$0]  %s145_s26, 16, %s147_s29, [#allocation9]  }
 0x1a7   :  { %271 = dma.done.wait [#allocation4], 16  }
 0x1a8   :  { %272 = vsyncadd [#allocation4], 4294967280 }
 0x1a9   :  { %273 = dma.done.wait [#allocation9], 16  }
 0x1aa   :  { %274 = vsyncadd [#allocation9], 4294967280 }
 0x1ab   :  { %158 = vsyncpa [#allocation3], 1 }
 0x1ac   :  { %159 = vsyncpa [#allocation6], 1 }
 0x1ad   :  { %160 = vsyncpa [#allocation4], 1 }
 0x1ae   :  { %161 = vsyncpa [#allocation9], 1 }

</bundles_post_ra>
